<compile_context>
chip_gen: v7x
topology: tpu7x:2x2x1
jax: 0.10.0
libtpu: 0.0.40
codegen_flags: <defaults>
</compile_context>

<pallas_src>
import math

import jax
import jax.numpy as jnp
from jax import lax
from jax.experimental import pallas as pl
from jax.experimental.pallas import tpu as pltpu


MXU_DTYPE = jnp.bfloat16            # native MXU operand dtype on v5e / v6e / v7x
_VMEM_LIMIT = 32 * 1024 * 1024      # explicit scoped-VMEM budget (v5e default is only 16 MiB)


def _round_up(x, m):
    return (x + m - 1) // m * m


def _seq_tile(t, max_tile):
    """Pick a sequence tile <= max_tile (8-aligned or full) and the padded length."""
    tp = _round_up(t, 8)
    if tp <= max_tile:
        return tp, tp
    tp = _round_up(t, max_tile)      # max_tile is a multiple of 128
    return max_tile, tp


# ----------------------------------------------------------------------------
# Tiled, pipelined linear (matmul) kernel
# ----------------------------------------------------------------------------
def _matmul_kernel(x_ref, w_ref, o_ref, acc_ref):
    @pl.when(pl.program_id(2) == 0)
    def _init():
        acc_ref[...] = jnp.zeros(acc_ref.shape, jnp.float32)

    acc_ref[...] += jnp.dot(x_ref[...], w_ref[...],
                            preferred_element_type=jnp.float32)

    @pl.when(pl.program_id(2) == pl.num_programs(2) - 1)
    def _finalize():
        o_ref[...] = acc_ref[...].astype(o_ref.dtype)


def pallas_linear(x, w, *, tm=512, tn=512, tk=512, out_dtype=None):
    """x: (M, K), w: (K, N) -> (M, N). Tiled 3-D grid with f32 accumulator."""
    M, K = x.shape
    K2, N = w.shape
    assert K == K2
    out_dtype = out_dtype if out_dtype is not None else x.dtype

    # Full-dim blocks for small dims (allowed regardless of alignment); otherwise
    # 512-wide tiles (multiples of 8 / 128) with zero padding.
    tm, Mp = (M, M) if M <= tm else (tm, _round_up(M, tm))
    tk, Kp = (K, K) if K <= tk else (tk, _round_up(K, tk))
    tn, Np = (N, N) if N <= tn else (tn, _round_up(N, tn))

    xp = x if (Mp == M and Kp == K) else jnp.pad(x, ((0, Mp - M), (0, Kp - K)))
    wp = w if (Kp == K and Np == N) else jnp.pad(w, ((0, Kp - K), (0, Np - N)))

    out = pl.pallas_call(
        _matmul_kernel,
        out_shape=jax.ShapeDtypeStruct((Mp, Np), out_dtype),
        grid=(Mp // tm, Np // tn, Kp // tk),
        in_specs=[
            pl.BlockSpec((tm, tk), lambda i, j, k: (i, k)),
            pl.BlockSpec((tk, tn), lambda i, j, k: (k, j)),
        ],
        out_specs=pl.BlockSpec((tm, tn), lambda i, j, k: (i, j)),
        scratch_shapes=[pltpu.VMEM((tm, tn), jnp.float32)],
        compiler_params=pltpu.CompilerParams(
            dimension_semantics=("parallel", "parallel", "arbitrary"),
            vmem_limit_bytes=_VMEM_LIMIT),
    )(xp, wp)
    if Mp != M or Np != N:
        out = out[:M, :N]
    return out


# ----------------------------------------------------------------------------
# Fused multi-head attention kernel: all heads per batch, query tiles, flash-style
# streaming over KV with online softmax, masked softmax with valid_lens, and the
# W_o projection fused into the epilogue as a heads-summed contraction.
# ----------------------------------------------------------------------------
def pallas_mha_attention(q, k, v, valid_lens, wo_heads, *, out_dtype,
                         q_tile=256, kv_tile=512):
    """q: (B*nh, Tq, hd), k/v: (B*nh, Tk, hd), valid_lens: (B,) int32,
    wo_heads: (nh, hd, H)  ->  (B, Tq, H) with the output projection fused in."""
    nh, hd, H = wo_heads.shape
    BH, Tq, _ = q.shape
    _, Tk, _ = k.shape
    B = BH // nh

    tq, Tq_p = _seq_tile(Tq, q_tile)
    tk, Tk_p = _seq_tile(Tk, kv_tile)
    if Tq_p != Tq:
        q = jnp.pad(q, ((0, 0), (0, Tq_p - Tq), (0, 0)))
    if Tk_p != Tk:
        k = jnp.pad(k, ((0, 0), (0, Tk_p - Tk), (0, 0)))
        v = jnp.pad(v, ((0, 0), (0, Tk_p - Tk), (0, 0)))
    n_kv = Tk_p // tk

    def kernel(vl_ref, q_ref, k_ref, v_ref, wo_ref, o_ref, m_sc, l_sc, acc_sc):
        b = pl.program_id(0)
        kv = pl.program_id(2)

        @pl.when(kv == 0)
        def _init():
            m_sc[...] = jnp.full(m_sc.shape, -jnp.inf, jnp.float32)
            l_sc[...] = jnp.zeros(l_sc.shape, jnp.float32)
            acc_sc[...] = jnp.zeros(acc_sc.shape, jnp.float32)

        vl = vl_ref[b]
        start = kv * tk

        # Skip KV tiles entirely beyond valid_len.  vl == 0 is degenerate (PyTorch masks
        # everything with -1e6 -> uniform softmax), so keep all tiles then.
        @pl.when(jnp.logical_or(start < vl, vl == 0))
        def _compute():
            qb = q_ref[...]                      # (nh, tq, hd), bf16; 1/sqrt(d) folded into W_q
            kb = k_ref[...]                      # (nh, tk, hd)
            vb = v_ref[...]                      # (nh, tk, hd)

            s = jnp.einsum("hqd,hkd->hqk", qb, kb,
                           preferred_element_type=jnp.float32)     # (nh, tq, tk) f32
            col = lax.broadcasted_iota(jnp.int32, s.shape, 2) + start
            s = jnp.where(col < vl, s, jnp.float32(-1.0e6))        # masked_softmax semantics
            if Tk_p != Tk:
                s = jnp.where(col < Tk, s, jnp.float32(-1.0e30))   # neutralize padded columns

            m_prev = m_sc[...]
            m_new = jnp.maximum(m_prev, s.max(axis=-1, keepdims=True))
            alpha = jnp.exp(m_prev - m_new)
            p = jnp.exp(s - m_new)
            l_sc[...] = alpha * l_sc[...] + p.sum(axis=-1, keepdims=True)
            acc_sc[...] = alpha * acc_sc[...] + jnp.einsum(
                "hqk,hkd->hqd", p.astype(vb.dtype), vb,
                preferred_element_type=jnp.float32)
            m_sc[...] = m_new

        @pl.when(kv == pl.num_programs(2) - 1)
        def _epilogue():
            # TODO(synk): dropout on attention weights omitted (eval-mode forward).
            # Heads-summed W_o contraction: sum_h (acc_h / l_h) @ W_o_h -> (tq, H).
            # No (nh, tq, H) intermediate, single lane-dense output slab.
            acc2d = jnp.zeros((acc_sc.shape[1], H), jnp.float32)
            for h in range(nh):
                inv_l = 1.0 / l_sc[h]                              # exact; (tq, 1), negligible
                outh = (acc_sc[h] * inv_l).astype(wo_ref.dtype)    # (tq, hd) bf16
                acc2d = acc2d + jnp.dot(outh, wo_ref[h],
                                        preferred_element_type=jnp.float32)
            o_ref[0] = acc2d.astype(o_ref.dtype)

    def kv_index_map(b, qi, j, vl_ref):
        # Clamp the KV block index for tiles beyond valid_len so skipped iterations
        # re-reference the previous block (no extra HBM DMA).
        vl = vl_ref[b]
        last = jnp.maximum((vl + tk - 1) // tk - 1, 0)
        jj = jnp.where(vl == 0, j, jnp.minimum(j, last))
        return (b, jj, 0)

    grid_spec = pltpu.PrefetchScalarGridSpec(
        num_scalar_prefetch=1,
        grid=(B, Tq_p // tq, n_kv),
        in_specs=[
            pl.BlockSpec((nh, tq, hd), lambda b, qi, j, vl: (b, qi, 0)),
            pl.BlockSpec((nh, tk, hd), kv_index_map),
            pl.BlockSpec((nh, tk, hd), kv_index_map),
            pl.BlockSpec((nh, hd, H), lambda b, qi, j, vl: (0, 0, 0)),
        ],
        out_specs=pl.BlockSpec((1, tq, H), lambda b, qi, j, vl: (b, qi, 0)),
        scratch_shapes=[
            pltpu.VMEM((nh, tq, 1), jnp.float32),    # m (online-softmax max)
            pltpu.VMEM((nh, tq, 1), jnp.float32),    # l (online-softmax denom)
            pltpu.VMEM((nh, tq, hd), jnp.float32),   # acc
        ],
    )
    out = pl.pallas_call(
        kernel,
        grid_spec=grid_spec,
        out_shape=jax.ShapeDtypeStruct((B, Tq_p, H), out_dtype),
        compiler_params=pltpu.CompilerParams(
            dimension_semantics=("parallel", "parallel", "arbitrary"),
            vmem_limit_bytes=_VMEM_LIMIT),
    )(valid_lens, q, k, v, wo_heads)
    # TODO(synk): for very large H the resident per-head W_o block should itself be N-tiled.
    if Tq_p != Tq:
        out = out[:, :Tq, :]
    return out


# ----------------------------------------------------------------------------
# MultiHeadAttention forward (thin JAX glue)
# ----------------------------------------------------------------------------
def transpose_qkv(x, num_heads):
    B, T, H = x.shape
    x = x.reshape(B, T, num_heads, H // num_heads)
    x = jnp.transpose(x, (0, 2, 1, 3))
    return x.reshape(B * num_heads, T, H // num_heads)


def transpose_output(x, num_heads):
    BH, T, hd = x.shape
    B = BH // num_heads
    x = x.reshape(B, num_heads, T, hd)
    x = jnp.transpose(x, (0, 2, 1, 3))
    return x.reshape(B, T, num_heads * hd)


def prepare_params(params, num_heads, mxu_dtype=MXU_DTYPE):
    """One-time weight prep: fold 1/sqrt(hd) into W_q, build fused W_qkv,
    reshape W_o per head, and cast to the MXU operand dtype (bf16)."""
    H = params["w_q"].shape[0]
    hd = H // num_heads
    w_q = params["w_q"] * (1.0 / math.sqrt(hd))
    return {
        "w_q": w_q.astype(mxu_dtype),
        "w_k": params["w_k"].astype(mxu_dtype),
        "w_v": params["w_v"].astype(mxu_dtype),
        "w_qkv": jnp.concatenate(
            [w_q, params["w_k"], params["w_v"]], axis=1).astype(mxu_dtype),
        "wo_heads": params["w_o"].reshape(num_heads, hd, H).astype(mxu_dtype),
    }


def multi_head_attention(prepared, queries, keys, values, valid_lens, num_heads,
                         mxu_dtype=MXU_DTYPE):
    """queries/keys/values: (B, T, num_hiddens); valid_lens: (B,) int or None.
    `prepared` comes from prepare_params (weights scaled/fused/cast once)."""
    B, Tq, H = queries.shape
    _, Tk, _ = keys.shape
    out_dtype = queries.dtype

    def proj(x, w):
        return pallas_linear(x.reshape(-1, x.shape[-1]).astype(mxu_dtype), w,
                             out_dtype=mxu_dtype)

    if queries is keys and keys is values:
        # Self-attention: fuse the three projections into a single (H, 3H) matmul.
        qkv = proj(queries, prepared["w_qkv"])               # (B*T, 3H) bf16
        q_p, k_p, v_p = qkv[:, :H], qkv[:, H:2 * H], qkv[:, 2 * H:]
    else:
        q_p = proj(queries, prepared["w_q"])
        k_p = proj(keys, prepared["w_k"])
        v_p = proj(values, prepared["w_v"])

    # TODO(synk): for hd < 128 a lane-dense (T, H) slab layout with in-kernel head slicing
    # would avoid these transposes and the narrow-lane K/V blocks.
    q = transpose_qkv(q_p.reshape(B, Tq, H), num_heads)      # (B*nh, Tq, hd) bf16
    k = transpose_qkv(k_p.reshape(B, Tk, H), num_heads)      # (B*nh, Tk, hd) bf16
    v = transpose_qkv(v_p.reshape(B, Tk, H), num_heads)      # (B*nh, Tk, hd) bf16

    if valid_lens is None:
        vl = jnp.full((B,), Tk, dtype=jnp.int32)
    else:
        # TODO(synk): only 1-D (per-sequence) valid_lens supported; d2l masked_softmax
        # also accepts per-query 2-D valid_lens.
        vl = valid_lens.astype(jnp.int32)

    # Attention + W_o output projection fused in one Pallas kernel -> (B, Tq, H).
    return pallas_mha_attention(q, k, v, vl, prepared["wo_heads"],
                                out_dtype=out_dtype)


# ----------------------------------------------------------------------------
# Pure-JAX reference (mirrors the PyTorch forward, full f32) for correctness checking
# ----------------------------------------------------------------------------
def reference_mha(params, queries, keys, values, valid_lens, num_heads):
    q = transpose_qkv(queries @ params["w_q"], num_heads)
    k = transpose_qkv(keys @ params["w_k"], num_heads)
    v = transpose_qkv(values @ params["w_v"], num_heads)
    d = q.shape[-1]
    scores = jnp.einsum("bqd,bkd->bqk", q, k) / math.sqrt(d)
    if valid_lens is not None:
        vl = jnp.repeat(valid_lens.astype(jnp.int32), num_heads, axis=0)
        col = jnp.arange(scores.shape[-1])[None, None, :]
        scores = jnp.where(col < vl[:, None, None], scores, -1.0e6)
    attn = jax.nn.softmax(scores, axis=-1)
    out = jnp.einsum("bqk,bkd->bqd", attn, v)
    return transpose_output(out, num_heads) @ params["w_o"]


# ----------------------------------------------------------------------------
if __name__ == "__main__":
    num_hiddens = 32
    num_heads = 4
    batch = 2
    seq_q = 8
    seq_k = 8

    key = jax.random.PRNGKey(0)
    k1, k2, k3, k4, k5, k6, k7 = jax.random.split(key, 7)

    scale = 1.0 / math.sqrt(num_hiddens)
    params = {
        "w_q": jax.random.uniform(k1, (num_hiddens, num_hiddens), jnp.float32, -scale, scale),
        "w_k": jax.random.uniform(k2, (num_hiddens, num_hiddens), jnp.float32, -scale, scale),
        "w_v": jax.random.uniform(k3, (num_hiddens, num_hiddens), jnp.float32, -scale, scale),
        "w_o": jax.random.uniform(k4, (num_hiddens, num_hiddens), jnp.float32, -scale, scale),
    }

    queries = jax.random.normal(k5, (batch, seq_q, num_hiddens), jnp.float32)
    keys = jax.random.normal(k6, (batch, seq_k, num_hiddens), jnp.float32)
    values = jax.random.normal(k7, (batch, seq_k, num_hiddens), jnp.float32)
    valid_lens = jnp.array([3, 6], dtype=jnp.int32)

    prepared = prepare_params(params, num_heads)   # one-time weight prep (scale/fuse/bf16)

    # Cross-attention path with per-sequence masking.
    out = multi_head_attention(prepared, queries, keys, values, valid_lens, num_heads)
    out = jax.block_until_ready(out)
    ref = reference_mha(params, queries, keys, values, valid_lens, num_heads)
    assert out.shape == (batch, seq_q, num_hiddens)
    # Tolerance re-derived for bf16 MXU operands (weights/activations cast to bf16,
    # f32 accumulation) vs the full-f32 reference.
    assert jnp.allclose(out, ref, atol=3e-2, rtol=3e-2), (
        f"cross-attn mismatch vs reference, max abs err = {jnp.max(jnp.abs(out - ref))}")

    # Self-attention path (fused QKV projection, no masking).
    out_self = multi_head_attention(prepared, queries, queries, queries, None, num_heads)
    out_self = jax.block_until_ready(out_self)
    ref_self = reference_mha(params, queries, queries, queries, None, num_heads)
    assert jnp.allclose(out_self, ref_self, atol=3e-2, rtol=3e-2), (
        f"self-attn mismatch vs reference, max abs err = {jnp.max(jnp.abs(out_self - ref_self))}")

    print("KERNEL_OK")
</pallas_src>

<mosaic_0001>
module attributes {stable_mosaic.version = 11 : i64} {
  func.func @_matmul_kernel(%arg0: i32, %arg1: i32, %arg2: i32, %arg3: memref<16x32xbf16, #tpu.memory_space<vmem>>, %arg4: memref<32x32xbf16, #tpu.memory_space<vmem>>, %arg5: memref<16x32xbf16, #tpu.memory_space<vmem>>, %arg6: memref<16x32xf32, #tpu.memory_space<vmem>>) attributes {dimension_semantics = [#tpu.dimension_semantics<parallel>, #tpu.dimension_semantics<parallel>, #tpu.dimension_semantics<arbitrary>], iteration_bounds = array<i64: 1, 1, 1>, scalar_prefetch = 0 : i64, scratch_operands = 1 : i64, tpu.core_type = #tpu.core_type<tc>, window_params = [{transform_indices = @transform_0, window_bounds = array<i64: 16, 32>}, {transform_indices = @transform_1, window_bounds = array<i64: 32, 32>}, {transform_indices = @transform_2, window_bounds = array<i64: 16, 32>}]} {
    %c0_i32 = arith.constant 0 : i32
    %0 = arith.cmpi eq, %arg2, %c0_i32 : i32
    %1 = arith.extui %0 : i1 to i32
    %c0_i32_0 = arith.constant 0 : i32
    %2 = arith.cmpi ne, %1, %c0_i32_0 : i32
    scf.if %2 {
      %cst_10 = arith.constant 0.000000e+00 : f32
      %12 = vector.broadcast %cst_10 : f32 to vector<16x32xf32>
      %c0_11 = arith.constant 0 : index
      %c0_12 = arith.constant 0 : index
      %13 = vector.load %arg6[%c0_11, %c0_12] : memref<16x32xf32, #tpu.memory_space<vmem>>, vector<16x32xf32>
      tpu.vector_store %arg6[%c0_11, %c0_12], %12 {strides = array<i32>} : memref<16x32xf32, #tpu.memory_space<vmem>>, vector<16x32xf32>,
    } else {
    }
    %c0 = arith.constant 0 : index
    %c0_1 = arith.constant 0 : index
    %3 = vector.load %arg6[%c0, %c0_1] : memref<16x32xf32, #tpu.memory_space<vmem>>, vector<16x32xf32>
    %c0_2 = arith.constant 0 : index
    %c0_3 = arith.constant 0 : index
    %4 = vector.load %arg3[%c0_2, %c0_3] : memref<16x32xbf16, #tpu.memory_space<vmem>>, vector<16x32xbf16>
    %c0_4 = arith.constant 0 : index
    %c0_5 = arith.constant 0 : index
    %5 = vector.load %arg4[%c0_4, %c0_5] : memref<32x32xbf16, #tpu.memory_space<vmem>>, vector<32x32xbf16>
    %cst = arith.constant dense<0.000000e+00> : vector<16x32xf32>
    %6 = tpu.matmul %4, %5, %cst {dimension_numbers = #tpu.dot_dimension_numbers<[1], [0], [0], [1], [0, 0, 1, 1], [], []>} : vector<16x32xbf16>, vector<32x32xbf16>, vector<16x32xf32> -> vector<16x32xf32>
    %7 = arith.addf %3, %6 : vector<16x32xf32>
    %c0_6 = arith.constant 0 : index
    %c0_7 = arith.constant 0 : index
    %8 = vector.load %arg6[%c0_6, %c0_7] : memref<16x32xf32, #tpu.memory_space<vmem>>, vector<16x32xf32>
    tpu.vector_store %arg6[%c0_6, %c0_7], %7 {strides = array<i32>} : memref<16x32xf32, #tpu.memory_space<vmem>>, vector<16x32xf32>,
    %c0_i32_8 = arith.constant 0 : i32
    %9 = arith.cmpi eq, %arg2, %c0_i32_8 : i32
    %10 = arith.extui %9 : i1 to i32
    %c0_i32_9 = arith.constant 0 : i32
    %11 = arith.cmpi ne, %10, %c0_i32_9 : i32
    scf.if %11 {
      %c0_10 = arith.constant 0 : index
      %c0_11 = arith.constant 0 : index
      %12 = vector.load %arg6[%c0_10, %c0_11] : memref<16x32xf32, #tpu.memory_space<vmem>>, vector<16x32xf32>
      %13 = arith.truncf %12 : vector<16x32xf32> to vector<16x32xbf16>
      %c0_12 = arith.constant 0 : index
      %c0_13 = arith.constant 0 : index
      %14 = vector.load %arg5[%c0_12, %c0_13] : memref<16x32xbf16, #tpu.memory_space<vmem>>, vector<16x32xbf16>
      tpu.vector_store %arg5[%c0_12, %c0_13], %13 {strides = array<i32>} : memref<16x32xbf16, #tpu.memory_space<vmem>>, vector<16x32xbf16>,
    } else {
    }
    return
  }
  func.func @transform_0(%arg0: i32, %arg1: i32, %arg2: i32) -> (i32, i32) {
    %c0_i32 = arith.constant 0 : i32
    return %arg0, %arg2 : i32, i32
  }
  func.func @transform_1(%arg0: i32, %arg1: i32, %arg2: i32) -> (i32, i32) {
    %c0_i32 = arith.constant 0 : i32
    return %arg2, %arg1 : i32, i32
  }
  func.func @transform_2(%arg0: i32, %arg1: i32, %arg2: i32) -> (i32, i32) {
    %c0_i32 = arith.constant 0 : i32
    return %arg0, %arg1 : i32, i32
  }
}

</mosaic_0001>

<bundles_post_ra>
// kernel: tpu_custom_call.1
= control target key start
LH: loop header
LB: loop body
LE: loop exit
PB: predicated region body
PF: predicated region fallthrough
CT: control target
= control target key end

     0   :  { %7 = vsyncpa [#allocation4], 0  ;;  %s329_s0 = inlined_call_operand.hbm [shape: bf16[16,32], index: 0, kind: input, shape index: {}]   ;;  %s330_s1 = inlined_call_operand.hbm [shape: bf16[32,32], index: 1, kind: input, shape index: {}]   ;;  %s331_s2 = inlined_call_operand.hbm [shape: bf16[16,32], index: 2, kind: output, shape index: {}]  }
   0x1   :  { %8 = vsyncpa [#allocation7], 0 }
   0x2   :  { %9 = vsyncpa [#allocation5], 0  ;;  %s257_s9 = smov [#allocation3]   ;;  %s185_s13 = scalar_lea.hbm %s329_s0, 128 }
   0x3   :  { %s15_s10 = sshll.u32 %s257_s9, 4  ;;  %p186_p0 = scmp.ne.s32.totalorder %s329_s0, %s185_s13  ;;  %s16_s10 = int_to_ptr.vmem [resolvable:$true] %s15_s10 }
   0x4   :  { %p189_p1 = scmp.lt.u32.totalorder %s185_s13, %s329_s0 }
   0x6   :  { %p191_p2 = pnand %p189_p1, %p186_p0 }
   0x8   :  { %194 = shalt.err (!%p191_p2)
}
   0x9   :  { %s195_s18 = scalar_lea.vmem %s16_s10, 128  ;;  %p200_p4 = scmp.lt.s32.totalorder %s16_s10, %s16_s10 }
   0xa   :  { %p196_p3 = scmp.ne.s32.totalorder %s16_s10, %s195_s18  ;;  %p201_p5 = scmp.lt.s32.totalorder %s195_s18, %s195_s18 }
   0xc   :  { %p202_p6 = por %p201_p5, %p200_p4 }
   0xe   :  { %p203_p7 = pnand %p202_p6, %p196_p3 }
  0x10   :  { %206 = shalt.err (!%p203_p7)
}
  0x11   :  { %s258_s19 = smov 64   ;;  %s259_s20 = smov 4  }
  0x12   :  { %21 = dma.hbm_to_vmem [thread:$0]  %s329_s0, 128, %s16_s10, [#allocation4], %s258_s19, %s258_s19, %s259_s20  }
  0x13   :  { %s260_s23 = smov [#allocation6]   ;;  %s207_s27 = scalar_lea.hbm %s330_s1, 256 }
  0x14   :  { %s27_s24 = sshll.u32 %s260_s23, 4  ;;  %p208_p8 = scmp.ne.s32.totalorder %s330_s1, %s207_s27  ;;  %s28_s24 = int_to_ptr.vmem [resolvable:$true] %s27_s24 }
  0x15   :  { %p211_p9 = scmp.lt.u32.totalorder %s207_s27, %s330_s1 }
  0x17   :  { %p213_p10 = pnand %p211_p9, %p208_p8 }
  0x19   :  { %216 = shalt.err (!%p213_p10)
}
  0x1a   :  { %s217_s4 = scalar_lea.vmem %s28_s24, 256  ;;  %p222_p12 = scmp.lt.s32.totalorder %s28_s24, %s28_s24 }
  0x1b   :  { %p218_p11 = scmp.ne.s32.totalorder %s28_s24, %s217_s4  ;;  %p223_p13 = scmp.lt.s32.totalorder %s217_s4, %s217_s4 }
  0x1d   :  { %p224_p0 = por %p223_p13, %p222_p12 }
  0x1f   :  { %p225_p1 = pnand %p224_p0, %p218_p11 }
  0x21   :  { %228 = shalt.err (!%p225_p1)
}
  0x22   :  { %33 = dma.hbm_to_vmem [thread:$0]  %s330_s1, 256, %s28_s24, [#allocation7], %s258_s19, %s258_s19, %s259_s20  }
  0x23   :  { %251 = dma.done.wait [#allocation4], 128  }
  0x24   :  { %252 = vsyncadd [#allocation4], 4294967168 }
  0x25   :  { %253 = dma.done.wait [#allocation7], 256  }
  0x26   :  { %254 = vsyncadd [#allocation7], 4294967040  ;;  %vm45_vm0 = vcmask 261120   ;;  %v261_v0 = vmov 0.0   ;;  %vm262_vm1 = vmmov 0   ;;  %v182_v1 = vld [vmem:[#allocation6] sm:$0xff]  }
  0x27   :  { %167 = vmatprep.subr.bf16.mxu0 %v261_v0  ;;  %171 = vmatprep.mubr.msk.bf16.mxu0 %vm262_vm1, %v261_v0  ;;  %46 = vst.msk [vmem:[#allocation2] sm:$0xff] %vm45_vm0, %v261_v0  ;;  %47 = vst.msk [vmem:[#allocation2 + $0x8] sm:$0xff] %vm45_vm0, %v261_v0  ;;  %v183_v2 = vld [vmem:[#allocation6 + $0x8] sm:$0xff]   ;;  %v184_v3 = vld [vmem:[#allocation3] sm:$0xff]   ;;  %vm135_vm2 = vcmask 257024   ;;  %s263_s1 = smov [#allocation8]  }
  0x28   :  { %168 = vmatpush3.bf16.msra.mxu0 %v182_v1  ;;  %s143_s6 = sshll.u32 %s263_s1, 4  ;;  %s144_s6 = int_to_ptr.vmem [resolvable:$true] %s143_s6 }
  0x29   :  { %169 = vmatprep.subr.bf16.mxu0 %v261_v0  ;;  %s229_s7 = scalar_lea.vmem %s144_s6, 128  ;;  %p234_p3 = scmp.lt.s32.totalorder %s144_s6, %s144_s6 }
  0x2a   :  { %p230_p2 = scmp.ne.s32.totalorder %s144_s6, %s229_s7  ;;  %p235_p4 = scmp.lt.s32.totalorder %s229_s7, %s229_s7 }
  0x2c   :  { %170 = vmatpush3.bf16.msra.mxu0 %v183_v2  ;;  %p236_p5 = por %p235_p4, %p234_p3 }
  0x2e   :  { %v48_v4 = vld [vmem:[#allocation2] sm:$0xff]  ;;  %v49_v6 = vld [vmem:[#allocation2 + $0x8] sm:$0xff]  ;;  %p237_p6 = pnand %p236_p5, %p230_p2 }
  0x2f   :  { %172 = vmatmul.mubr.msk.bf16.vlgmr.msra.gmra.mrb[0].mxu0 %vm45_vm0, %v184_v3 }
 0x102   :  { %v111_v5 = vpop.f32.mrb[0].mxu0 }
 0x103   :  { %v118_v7 = vadd.f32 %v111_v5, %v48_v4  ;;  %v173_v8 = vpop.f32.mrb[1].mxu0 }
 0x104   :  { %v114_v9 = vpop.f32.mrb[2].mxu0 }
 0x105   :  { %120 = vst.msk [vmem:[#allocation2] sm:$0xff] %vm45_vm0, %v118_v7  ;;  %v119_v10 = vadd.f32 %v114_v9, %v49_v6  ;;  %v174_v11 = vpop.f32.mrb[3].mxu0 }
 0x107   :  { %121 = vst.msk [vmem:[#allocation2 + $0x8] sm:$0xff] %vm45_vm0, %v119_v10 }
 0x10c   :  { %v125_v12 = vld [vmem:[#allocation2] sm:$0xff] }
 0x10d   :  { %v162_v13 = vpack.c.bf16 %v125_v12, %v125_v12 }
 0x10e   :  { %v126_v14 = vld [vmem:[#allocation2 + $0x8] sm:$0xff] }
 0x10f   :  { %v163_v15 = vpack.c.bf16 %v126_v14, %v126_v14  ;;  %136 = vst.msk [vmem:[#allocation8] sm:$0xf] %vm135_vm2, %v162_v13 }
 0x111   :  { %137 = vst.msk [vmem:[#allocation8 + $0x4] sm:$0xf] %vm135_vm2, %v163_v15 }
 0x112   :  { %240 = shalt.err (!%p237_p6)
}
 0x113   :  { %s241_s10 = scalar_lea.hbm %s331_s2, 128 }
 0x114   :  { %p242_p7 = scmp.ne.s32.totalorder %s331_s2, %s241_s10  ;;  %p245_p8 = scmp.lt.u32.totalorder %s241_s10, %s331_s2 }
 0x116   :  { %p247_p9 = pnand %p245_p8, %p242_p7 }
 0x118   :  { %250 = shalt.err (!%p247_p9)
}
 0x119   :  { %149 = dma.vmem_to_hbm [thread:$0]  %s144_s6, 128, %s331_s2, [#allocation5], %s258_s19, %s258_s19, %s259_s20  }
 0x11a   :  { %255 = dma.done.wait [#allocation5], 128  }
 0x11b   :  { %256 = vsyncadd [#allocation5], 4294967168 }
 0x11c   :  { %153 = vsyncpa [#allocation4], 1 }
 0x11d   :  { %154 = vsyncpa [#allocation7], 1 }
 0x11e   :  { %155 = vsyncpa [#allocation5], 1 }

</bundles_post_ra>
